<compile_context>
chip_gen: v5e
topology: v5e:2x2
jax: 0.10.0
libtpu: 0.0.40
codegen_flags: <defaults>
</compile_context>

<pallas_src>
import jax
import jax.numpy as jnp
from jax.experimental import pallas as pl
from jax.experimental.pallas import tpu as pltpu


def _make_adjust_kernel(compute_dtype):
    def _adjust_kernel(w_ref, b_ref, x_ref, o_ref):
        # w_ref: (Cout, Cin)    compute dtype (BN scale already folded in)
        # b_ref: (Cout, 1)      f32 column bias
        # x_ref: (Cin, TILE_HW) f32 or compute dtype (cast below is a no-op if
        #                        the wrapper already quantized it)
        # o_ref: (Cout, TILE_HW) out dtype
        xb = x_ref[...].astype(compute_dtype)
        acc = jnp.dot(w_ref[...], xb, preferred_element_type=jnp.float32)
        o_ref[...] = (acc + b_ref[...]).astype(o_ref.dtype)
    return _adjust_kernel


def _largest_lane_divisor_tile(total, cap, lane=128):
    """Largest multiple of `lane` that is <= cap and divides `total`
    (total is assumed to be a multiple of `lane`)."""
    t = min(cap, total)
    t = max(lane, (t // lane) * lane)
    while total % t != 0:
        t -= lane
    return t


def adjust_layer_pallas(x_nchw, conv_w, gamma, beta, running_mean, running_var,
                        eps=1e-5, max_tile_hw=1024,
                        compute_dtype=jnp.bfloat16, out_dtype=jnp.float32):
    """x_nchw: (N, Cin, H, W).  conv_w: (Cout, Cin) (1x1 kernel squeezed)."""
    N, Cin, H, W = x_nchw.shape
    Cout = conv_w.shape[0]
    HW = H * W
    LANE = 128

    # ---- Fold eval-mode BN into per-output-channel scale (weight) + bias ----
    scale = (gamma.astype(jnp.float32)
             / jnp.sqrt(running_var.astype(jnp.float32) + eps))          # (Cout,)
    bias = beta.astype(jnp.float32) - running_mean.astype(jnp.float32) * scale
    w_scaled = (conv_w.astype(jnp.float32) * scale[:, None]).astype(compute_dtype)
    bias_col = bias.reshape(Cout, 1)                                     # f32

    # ---- Lane-aligned H*W tiling (tile divides padded HW; pad < 128/row) ----
    HWp = pl.cdiv(HW, LANE) * LANE
    tile_hw = _largest_lane_divisor_tile(HWp, max_tile_hw, LANE)

    # NCHW is already (N, Cin, H*W)-contiguous: reshape only, no transpose.
    x3 = x_nchw.reshape(N, Cin, HW)
    if HWp != HW:
        # Pad + quantize in one fused wrapper pass (reads f32, writes bf16).
        x3 = jnp.pad(x3.astype(compute_dtype), ((0, 0), (0, 0), (0, HWp - HW)))
        x_bytes = jnp.dtype(compute_dtype).itemsize
    else:
        # No pad needed -> hand f32 straight to the kernel and cast on-chip
        # (avoids a full extra HBM read/write pass over x in the wrapper).
        x_bytes = jnp.dtype(x3.dtype).itemsize
    o_bytes = jnp.dtype(out_dtype).itemsize
    w_bytes = jnp.dtype(compute_dtype).itemsize

    def footprint(t):
        # double-buffered x + out blocks, resident weight + bias
        return (2 * t * (Cin * x_bytes + Cout * o_bytes)
                + Cout * Cin * w_bytes + Cout * 4)

    budget = 24 * 1024 * 1024   # conservative: fits default scoped VMEM, v7x-safe
    while tile_hw > LANE and footprint(tile_hw) > budget:
        tile_hw = _largest_lane_divisor_tile(HWp, tile_hw - LANE, LANE)

    grid = (N, HWp // tile_hw)

    cost = pl.CostEstimate(
        flops=2 * N * Cout * Cin * HWp,
        transcendentals=0,
        bytes_accessed=(N * Cin * HWp * x_bytes
                        + N * Cout * HWp * o_bytes
                        + Cout * Cin * w_bytes + Cout * 4))

    vmem_limit = min(64 * 1024 * 1024,
                     max(32 * 1024 * 1024, 2 * footprint(tile_hw)))

    out3 = pl.pallas_call(
        _make_adjust_kernel(compute_dtype),
        out_shape=jax.ShapeDtypeStruct((N, Cout, HWp), out_dtype),
        grid_spec=pltpu.PrefetchScalarGridSpec(
            num_scalar_prefetch=0,
            grid=grid,
            in_specs=[
                pl.BlockSpec((Cout, Cin), lambda n, j: (0, 0)),   # folded weight (resident)
                pl.BlockSpec((Cout, 1), lambda n, j: (0, 0)),     # bias column (resident)
                pl.BlockSpec((None, Cin, tile_hw), lambda n, j: (n, 0, j)),
            ],
            out_specs=pl.BlockSpec((None, Cout, tile_hw), lambda n, j: (n, 0, j)),
        ),
        compiler_params=pltpu.CompilerParams(
            dimension_semantics=("parallel", "parallel"),
            vmem_limit_bytes=vmem_limit),
        cost_estimate=cost,
    )(w_scaled, bias_col, x3)

    # Drop lane padding and restore NCHW (slice is a no-op if HWp == HW).
    y_nchw = out3[:, :, :HW].reshape(N, Cout, H, W)

    # Forward control flow (static shapes -> static Python branch), matches PyTorch.
    if W < 20:
        row_x = y_nchw
        l = 4
        r = l + 7
        y_crop = y_nchw[:, :, l:r, l:r]
        return y_crop, row_x
    else:
        row_x = jnp.array([0], dtype=jnp.int32)
        return y_nchw, row_x


def _reference(x_nchw, conv_w, gamma, beta, running_mean, running_var,
               eps=1e-5, compute_dtype=jnp.bfloat16):
    # Pure-JAX reference of conv1x1 + eval BN using the SAME bf16-quantized
    # operands and f32 accumulation as the kernel.
    scale = gamma / jnp.sqrt(running_var + eps)
    bias = beta - running_mean * scale
    w_scaled = (conv_w * scale[:, None]).astype(compute_dtype).astype(jnp.float32)
    xq = x_nchw.astype(compute_dtype).astype(jnp.float32)
    y = jnp.einsum('nchw,oc->nohw', xq, w_scaled,
                   precision=jax.lax.Precision.HIGHEST)
    return y + bias[None, :, None, None]


if __name__ == "__main__":
    key = jax.random.PRNGKey(0)
    k_x, k_w, k_g, k_b, k_m, k_v = jax.random.split(key, 6)

    N, Cin, Cout, H, W = 2, 4, 8, 16, 16   # W=16 < 20 -> crop branch is taken
    x = jax.random.normal(k_x, (N, Cin, H, W), dtype=jnp.float32)
    conv_w = jax.random.normal(k_w, (Cout, Cin), dtype=jnp.float32) * 0.1
    gamma = 1.0 + 0.1 * jax.random.normal(k_g, (Cout,), dtype=jnp.float32)
    beta = 0.1 * jax.random.normal(k_b, (Cout,), dtype=jnp.float32)
    running_mean = 0.05 * jax.random.normal(k_m, (Cout,), dtype=jnp.float32)
    running_var = 1.0 + 0.1 * jax.nn.softplus(
        jax.random.normal(k_v, (Cout,), dtype=jnp.float32))

    y_crop, row_x = adjust_layer_pallas(x, conv_w, gamma, beta,
                                        running_mean, running_var)
    jax.block_until_ready((y_crop, row_x))

    # sanity check vs pure-JAX reference (same bf16 operand quantization)
    ref_full = _reference(x, conv_w, gamma, beta, running_mean, running_var)
    ref_crop = ref_full[:, :, 4:11, 4:11]
    assert y_crop.shape == (N, Cout, 7, 7)
    assert row_x.shape == (N, Cout, H, W)
    assert jnp.allclose(row_x, ref_full, atol=1e-3, rtol=1e-3)
    assert jnp.allclose(y_crop, ref_crop, atol=1e-3, rtol=1e-3)

    print("KERNEL_OK")
</pallas_src>

<mosaic_0001>
module attributes {stable_mosaic.version = 11 : i64} {
  func.func @_adjust_kernel(%arg0: i32, %arg1: i32, %arg2: memref<8x4xbf16, #tpu.memory_space<vmem>>, %arg3: memref<8x1xf32, #tpu.memory_space<vmem>>, %arg4: memref<1x4x256xf32, #tpu.memory_space<vmem>>, %arg5: memref<1x8x256xf32, #tpu.memory_space<vmem>>) attributes {dimension_semantics = [#tpu.dimension_semantics<parallel>, #tpu.dimension_semantics<parallel>], iteration_bounds = array<i64: 2, 1>, scalar_prefetch = 0 : i64, scratch_operands = 0 : i64, tpu.core_type = #tpu.core_type<tc>, window_params = [{pipeline_mode = #tpu.pipeline_mode<synchronous>, transform_indices = @transform_0, window_bounds = array<i64: 8, 4>}, {pipeline_mode = #tpu.pipeline_mode<synchronous>, transform_indices = @transform_1, window_bounds = array<i64: 8, 1>}, {transform_indices = @transform_2, window_bounds = array<i64: 1, 4, 256>}, {transform_indices = @transform_3, window_bounds = array<i64: 1, 8, 256>}]} {
    %c0 = arith.constant 0 : index
    %c0_0 = arith.constant 0 : index
    %c0_1 = arith.constant 0 : index
    %0 = vector.load %arg4[%c0, %c0_0, %c0_1] : memref<1x4x256xf32, #tpu.memory_space<vmem>>, vector<1x4x256xf32>
    %1 = vector.shape_cast %0 : vector<1x4x256xf32> to vector<4x256xf32>
    %2 = arith.truncf %1 : vector<4x256xf32> to vector<4x256xbf16>
    %c0_2 = arith.constant 0 : index
    %c0_3 = arith.constant 0 : index
    %3 = vector.load %arg2[%c0_2, %c0_3] : memref<8x4xbf16, #tpu.memory_space<vmem>>, vector<8x4xbf16>
    %cst = arith.constant dense<0.000000e+00> : vector<8x256xf32>
    %4 = tpu.matmul %3, %2, %cst {dimension_numbers = #tpu.dot_dimension_numbers<[1], [0], [0], [1], [0, 0, 1, 1], [], []>} : vector<8x4xbf16>, vector<4x256xbf16>, vector<8x256xf32> -> vector<8x256xf32>
    %c0_4 = arith.constant 0 : index
    %c0_5 = arith.constant 0 : index
    %5 = vector.load %arg3[%c0_4, %c0_5] : memref<8x1xf32, #tpu.memory_space<vmem>>, vector<8x1xf32>
    %6 = vector.broadcast %5 : vector<8x1xf32> to vector<8x256xf32>
    %7 = arith.addf %4, %6 : vector<8x256xf32>
    %c0_6 = arith.constant 0 : index
    %c0_7 = arith.constant 0 : index
    %c0_8 = arith.constant 0 : index
    %8 = vector.load %arg5[%c0_6, %c0_7, %c0_8] : memref<1x8x256xf32, #tpu.memory_space<vmem>>, vector<1x8x256xf32>
    %9 = vector.shape_cast %8 : vector<1x8x256xf32> to vector<8x256xf32>
    %10 = vector.shape_cast %7 : vector<8x256xf32> to vector<1x8x256xf32>
    tpu.vector_store %arg5[%c0_6, %c0_7, %c0_8], %10 {strides = array<i32>} : memref<1x8x256xf32, #tpu.memory_space<vmem>>, vector<1x8x256xf32>,
    return
  }
  func.func @transform_0(%arg0: i32, %arg1: i32) -> (i32, i32) {
    %c0_i32 = arith.constant 0 : i32
    %c0_i32_0 = arith.constant 0 : i32
    %c0_i32_1 = arith.constant 0 : i32
    return %c0_i32, %c0_i32_0 : i32, i32
  }
  func.func @transform_1(%arg0: i32, %arg1: i32) -> (i32, i32) {
    %c0_i32 = arith.constant 0 : i32
    %c0_i32_0 = arith.constant 0 : i32
    %c0_i32_1 = arith.constant 0 : i32
    return %c0_i32, %c0_i32_0 : i32, i32
  }
  func.func @transform_2(%arg0: i32, %arg1: i32) -> (i32, i32, i32) {
    %c0_i32 = arith.constant 0 : i32
    %c0_i32_0 = arith.constant 0 : i32
    return %arg0, %c0_i32, %arg1 : i32, i32, i32
  }
  func.func @transform_3(%arg0: i32, %arg1: i32) -> (i32, i32, i32) {
    %c0_i32 = arith.constant 0 : i32
    %c0_i32_0 = arith.constant 0 : i32
    return %arg0, %c0_i32, %arg1 : i32, i32, i32
  }
}

</mosaic_0001>

<bundles_post_ra>
// kernel: tpu_custom_call.1
= control target key start
LH: loop header
LB: loop body
LE: loop exit
PB: predicated region body
PF: predicated region fallthrough
CT: control target
= control target key end

     0   :  { %8 = vsyncpa [#allocation3], 0  ;;  %s629_s0 = inlined_call_operand.vmem [shape: bf16[8,4], index: 0, kind: input, shape index: {}]   ;;  %s630_s1 = inlined_call_operand.vmem [shape: f32[8,1], index: 1, kind: input, shape index: {}]   ;;  %s631_s2 = inlined_call_operand.vmem [shape: f32[2,4,256], index: 2, kind: input, shape index: {}]   ;;  %s632_s3 = inlined_call_operand.hbm [shape: f32[2,8,256], index: 3, kind: output, shape index: {}]  }
   0x1   :  { %10 = vsyncpa [#allocation3 + $0x1], 0  ;;  %s526_s12 = smov 0   ;;  %s528_s13 = smov 0  }
   0x2   :  { %s530_s14 = smov 0   ;;  %s532_s15 = smov 0  }
   0x3   :  { %s534_s16 = smov 0   ;;  %s536_s17 = smov 0  }
   0x4 LB: > { %s351_s18 = sadd.s32 4294967295, %s503_s17   ;;  %s352_s19 = sadd.s32 4294967294, %s503_s17   ;;  %s503_s17 = sphi %s536_s17, %s16_s17   ;;  %s499_s16 = sphi %s534_s16, %s639_s16   ;;  %s495_s15 = sphi %s532_s15, %s638_s15   ;;  %s491_s14 = sphi %s530_s14, %s637_s14   ;;  %s487_s13 = sphi %s528_s13, %s636_s13   ;;  %s483_s12 = sphi %s526_s12, %s635_s12  }
   0x5   : > { %s28_s20 = sadd.s32 1, %s499_s16  ;;  %s107_s21 = sadd.s32 1, %s491_s14 }
   0x6   : > { %p30_p0 = scmp.ge.s32.totalorder %s28_s20, 2  ;;  %p117_p1 = scmp.ne.s32.totalorder %s491_s14, %s487_s13 }
   0x7   : > { %p118_p2 = scmp.eq.s32.totalorder %s351_s18, 1  ;;  %p123_p3 = scmp.ne.s32.totalorder %s487_s13, %s483_s12 }
   0x8   : > { %s641_s20 = smov (%p30_p0, %s28_s20), 0  ;;  %p124_p5 = scmp.eq.s32.totalorder %s352_s19, 1 }
   0x9   : > { %p566_p4 = por %p118_p2, %p117_p1  ;;  %s102_s23 = ssub.s32 %s499_s16, %s641_s20 }
   0xa   : > { %p355_p6 = scmp.ge.s32.totalorder %s503_s17, 1  ;;  %p105_p7 = scmp.eq.s32.totalorder %s102_s23, 0 }
   0xb   : > { %p573_p8 = por %p124_p5, %p123_p3  ;;  %p161_p9 = scmp.lt.s32.totalorder %s503_s17, 3 }
   0xc   : > { %s579_s25 = scalar_select %p105_p7, %s491_s14, %s107_s21  }
   0xd   : > { %p162_p10 = pnand %p355_p6, %p161_p9 }
   0xe   : > { %p190_p11 = scmp.lt.s32.totalorder (!%p162_p10), %s495_s15, 1  ;;  %s186_s8 = sand.u32 (!%p162_p10), 1, %s487_s13  }
   0xf   : > { %165 = sbr.rel (%p162_p10) target bundleno = 173 (0xad), region = 32  ;;  %s367_s9 = sshll.u32 (!%p162_p10), %s495_s15, 4 }
  0x10   : > { %s356_s10 = sshll.u32 (!%p162_p10), %s186_s8, 4  ;;  %s270_s19 = scalar_lea.hbm (!%p162_p10), %s632_s3, %s367_s9 }
  0x11   : > { %s188_s21 = scalar_lea.vmem (!%p162_p10), [#allocation2], %s356_s10  ;;  %s274_s26 = sshll.u32 (!%p162_p10), %s270_s19, 4  ;;  %s275_s26 = int_to_ptr.hbm [resolvable:$true] %s274_s26 }
  0x12   : > { %s272_s23 = sshll.u32 (!%p162_p10), %s188_s21, 4  ;;  %s257_s27 = scalar_lea.sflag (!%p162_p10), [#allocation3], %s186_s8  ;;  %s273_s23 = int_to_ptr.vmem [resolvable:$true] %s272_s23 }
  0x13   : > { %s445_s4 = scalar_lea.hbm (!%p162_p10), %s632_s3, 32 }
  0x14   : > { %v505_v0 = vmov 0   ;;  %v211_v1 = vld [vmem:[%s630_s1] sm:$0xff]  ;;  %s191_s28 = scalar_select %p190_p11, %s495_s15, 1  ;;  %vm221_vm0 = vcmask 1041408   ;;  %vm217_vm1 = vcmask 31744  }
  0x15   : > { %424 = vset.pattern.permute.xlu0 %v505_v0  ;;  %v210_v9 = vld [vmem:[%s629_s0] sm:$0xf]  ;;  %s439_s15 = sshra.s32 %s275_s26, 4  ;;  %s440_s15 = int_to_ptr.hbm [resolvable:$true] %s439_s15 }
  0x16   : > { %214 = vperm.xlu0 %424, %v211_v1   ;;  %s366_s29 = sshll.u32 %s191_s28, 3  ;;  %s441_s28 = scalar_lea.hbm %s440_s15, 16 }
  0x17   : > { %s197_s5 = scalar_lea.vmem %s631_s2, %s366_s29  ;;  %p442_p12 = scmp.ne.s32.totalorder %s440_s15, %s441_s28 }
  0x18   : > { %v201_v2 = vld [vmem:[%s197_s5] sm:$0xff]  ;;  %p446_p1 = scmp.lt.s32.totalorder %s440_s15, %s632_s3  ;;  %p447_p2 = scmp.lt.s32.totalorder %s445_s4, %s441_s28 }
  0x19   : > { %203 = vst [vmem:[#allocation1] ss:$2 sm:$0xff] %v201_v2  ;;  %p443_p13 = pnand %p442_p12, %p566_p4 }
  0x1a   : > { %p448_p3 = por %p447_p2, %p446_p1 }
  0x1b   : > { %p444_p0 = pneg %p443_p13 }
  0x1d   : > { %p449_p5 = pnand %p448_p3, %p444_p0 }
  0x20   : > { %v204_v3 = vld.sshfl [vmem:[#allocation1] sm:$0xff pattern:$0x75316420]  ;;  %v205_v4 = vld.sshfl [vmem:[#allocation1 + $0x8] sm:$0xff pattern:$0x75316420] }
  0x21   : > { %v208_v5 = vpack.c.bf16 %v204_v3, %v204_v3  ;;  %v209_v6 = vpack.c.bf16 %v205_v4, %v205_v4 }
  0x23   : > { %v223_v7 = vsel %vm221_vm0, %v208_v5, 0  ;;  %v226_v8 = vsel %vm221_vm0, %v209_v6, 0 }
  0x24   : > { %235 = vmatpush.bf16.msra.mxu0 %v223_v7  ;;  %248 = vmatpush.bf16.msra.mxu1 %v226_v8 }
  0x27   : > { %359 = vmatmul.msk.bf16.vlgmr.msra.gmra.mxu0 %vm217_vm1, %v210_v9  ;;  %360 = vmatmul.msk.bf16.vlgmr.msra.gmra.mxu1 %vm217_vm1, %v210_v9 }
  0x88   : > { %v215_v10 = vpop.permute.xlu0 %214 }
  0xa4   : > { %v237_v11 = vpop.f32.mrf.mxu0  ;;  %v250_v12 = vpop.f32.mrf.mxu1 }
  0xa5   : > { %v238_v13 = vadd.f32 %v237_v11, %v215_v10  ;;  %v251_v14 = vadd.f32 %v250_v12, %v215_v10 }
  0xa7   : > { %254 = vst [vmem:[%s188_s21] sm:$0xff] %v238_v13 }
  0xa8   : > { %255 = vst [vmem:[%s188_s21 + $0x8] sm:$0xff] %v251_v14 }
  0xa9   : > { %452 = shalt.err (!%p449_p5)
}
  0xaa   : > { %368 = dma.vmem_to_hbm [thread:$0]  (%p566_p4), %s273_s23, 256, %s275_s26, %s257_s27  }
  0xac   : > { %v239_v15 = vpop.f32.mrf.mxu0  ;;  %v252_v16 = vpop.f32.mrf.mxu1 }
  0xad PF: > { %p374_p6 = scmp.ge.s32.totalorder %s503_s17, 2  ;;  %s286_s7 = sand.u32 1, %s483_s12  }
  0xae   : > { %s287_s8 = scalar_lea.sflag [#allocation3], %s286_s7 }
  0xaf   : > { %p371_p7 = pnand %p374_p6, %p573_p8 }
  0xb1   : > { %p372_p9 = pneg %p371_p7 }
  0xb3   : > { %478 = dma.done.wait (%p372_p9), %s287_s8, 256  }
  0xb4   : > { %480 = vsyncadd (%p372_p9), %s287_s8, 4294967040  ;;  %s16_s17 = sadd.s32 1, %s503_s17   ;;  %s635_s12 = smov %s487_s13 }
  0xb5   : > { %p13_p10 = scmp.ge.s32.totalorder %s16_s17, 4   ;;  %s636_s13 = smov %s491_s14 }
  0xb6   : > { %s637_s14 = smov %s579_s25  ;;  %s638_s15 = smov %s499_s16 }
  0xb7   : > { %s639_s16 = smov %s641_s20  ;;  %15 = sbr.rel (!%p13_p10) target bundleno = 4 (0x4), region = 67 }
  0xbc   :  { %293 = vsyncpa [#allocation3], 1 }
  0xbd   :  { %295 = vsyncpa [#allocation3 + $0x1], 1 }

</bundles_post_ra>
